<compile_context>
chip_gen: v7x
topology: tpu7x:2x2x1
jax: 0.10.0
libtpu: 0.0.40
codegen_flags: <defaults>
</compile_context>

<pallas_src>
import functools

import jax
import jax.numpy as jnp
from jax.experimental import pallas as pl
from jax.experimental.pallas import tpu as pltpu


def _min_value(dtype):
    dtype = jnp.dtype(dtype)
    if jnp.issubdtype(dtype, jnp.floating):
        return float("-inf")
    return int(jnp.iinfo(dtype).min)


def _pick_tiles(rows, hw, dtype_bytes):
    """Choose (row_block, hw_block) for a pure HBM-bandwidth-bound row max."""
    # Sublane packing: 8 rows for 32-bit, 16 for bf16, 32 for int8/fp8.
    pack = {4: 8, 2: 16, 1: 32}.get(dtype_bytes, 8)
    budget = 6 * 1024 * 1024  # bytes per input tile (double-buffered by Pallas)

    # Prefer the whole HW axis in one tile (single reduction step, no mask).
    hw_block = hw
    if hw > 128 and hw * dtype_bytes * pack > budget:
        # Tile HW in multiples of 128 so at least `pack` rows fit per tile.
        hw_block = max(128, (budget // (pack * dtype_bytes)) // 128 * 128)
        hw_block = min(hw_block, (hw // 128) * 128)

    row_block = budget // (hw_block * dtype_bytes)
    row_block = max(pack, min((row_block // pack) * pack, 1024))
    # No point in a row block larger than the (packing-rounded) row count.
    row_block = min(row_block, pl.cdiv(rows, pack) * pack)
    return row_block, hw_block


def _maxpool_kernel(x_ref, o_ref, *, hw, hw_block, min_val, mask_hw_tail):
    k = pl.program_id(1)  # reduction (HW) step

    @pl.when(k == 0)
    def _init():
        o_ref[...] = jnp.full(o_ref.shape, min_val, dtype=o_ref.dtype)

    tile = x_ref[...]  # (row_block, hw_block)
    if mask_hw_tail:
        # Last HW tile may read out-of-bounds lanes: mask them to the identity.
        lane = jax.lax.broadcasted_iota(jnp.int32, tile.shape, 1) + k * hw_block
        tile = jnp.where(lane < hw, tile, jnp.asarray(min_val, tile.dtype))

    part = jnp.max(tile, axis=-1)  # (row_block,)
    # Lane-dense running max, accumulated directly in the resident output block.
    o_ref[...] = jnp.maximum(o_ref[...], part[None, :])


def global_maxpool2d(x: jax.Array, *, force_pallas: bool = False) -> jax.Array:
    """x: (N, C, H, W) -> (N, C, 1, 1), global max over H and W."""
    n, c, h, w = x.shape
    rows, hw = n * c, h * w
    dtype_bytes = jnp.dtype(x.dtype).itemsize

    # Tiny inputs: a fused XLA reduce beats pallas_call launch/step overhead.
    if not force_pallas and rows * hw * dtype_bytes < (2 << 20):
        return jnp.max(x, axis=(2, 3), keepdims=True)

    row_block, hw_block = _pick_tiles(rows, hw, dtype_bytes)
    num_row_blocks = pl.cdiv(rows, row_block)
    num_hw_blocks = pl.cdiv(hw, hw_block)
    min_val = _min_value(x.dtype)

    # No host-side padded copy of the input: ragged last row/HW blocks are
    # handled by Pallas (garbage rows are discarded by the [:rows] slice).
    x2d = x.reshape(rows, hw)

    kernel = functools.partial(
        _maxpool_kernel,
        hw=hw,
        hw_block=hw_block,
        min_val=min_val,
        mask_hw_tail=(hw % hw_block) != 0,
    )

    out = pl.pallas_call(
        kernel,
        out_shape=jax.ShapeDtypeStruct((num_row_blocks, row_block), x.dtype),
        grid_spec=pltpu.PrefetchScalarGridSpec(
            num_scalar_prefetch=0,
            grid=(num_row_blocks, num_hw_blocks),  # reduction axis last
            in_specs=[pl.BlockSpec((row_block, hw_block), lambda i, k: (i, k))],
            # Lane-dense output: one (1, row_block) block per row tile,
            # resident across the HW (reduction) axis -> in-place accumulate.
            out_specs=pl.BlockSpec((1, row_block), lambda i, k: (i, 0)),
        ),
        compiler_params=pltpu.CompilerParams(
            dimension_semantics=("parallel", "arbitrary"),
            vmem_limit_bytes=32 * 1024 * 1024,
        ),
        cost_estimate=pl.CostEstimate(
            flops=0,
            transcendentals=0,
            bytes_accessed=rows * hw * dtype_bytes + rows * dtype_bytes,
        ),
    )(x2d)

    return out.reshape(num_row_blocks * row_block)[:rows].reshape(n, c, 1, 1)


if __name__ == "__main__":
    key = jax.random.PRNGKey(0)
    # Small NCHW input consistent with the module: batch=2, channels=4, 16x16.
    x = jax.random.normal(key, (2, 4, 16, 16), dtype=jnp.float32)

    # Force the Pallas path so the kernel itself is exercised on TPU.
    out = global_maxpool2d(x, force_pallas=True)
    out = jax.block_until_ready(out)

    # Reference check (pure JAX) for the global max pool semantics.
    ref = jnp.max(x, axis=(2, 3), keepdims=True)
    assert out.shape == (2, 4, 1, 1), out.shape
    assert jnp.allclose(out, ref), "mismatch vs reference"

    # Tiny-input fast path (default dispatch) must agree as well.
    out_fast = jax.block_until_ready(global_maxpool2d(x))
    assert jnp.allclose(out_fast, ref), "fast-path mismatch vs reference"

    print("KERNEL_OK")
</pallas_src>

<mosaic_0001>
module attributes {stable_mosaic.version = 11 : i64} {
  func.func @_maxpool_kernel(%arg0: i32, %arg1: i32, %arg2: memref<8x256xf32, #tpu.memory_space<vmem>>, %arg3: memref<1x8xf32, #tpu.memory_space<vmem>>) attributes {dimension_semantics = [#tpu.dimension_semantics<parallel>, #tpu.dimension_semantics<arbitrary>], iteration_bounds = array<i64: 1, 1>, scalar_prefetch = 0 : i64, scratch_operands = 0 : i64, tpu.core_type = #tpu.core_type<tc>, window_params = [{transform_indices = @transform_0, window_bounds = array<i64: 8, 256>}, {transform_indices = @transform_1, window_bounds = array<i64: 1, 8>}]} {
    %c0_i32 = arith.constant 0 : i32
    %0 = arith.cmpi eq, %arg1, %c0_i32 : i32
    %1 = arith.extui %0 : i1 to i32
    %c0_i32_0 = arith.constant 0 : i32
    %2 = arith.cmpi ne, %1, %c0_i32_0 : i32
    scf.if %2 {
      %cst_6 = arith.constant 0xFF800000 : f32
      %9 = vector.broadcast %cst_6 : f32 to vector<1x8xf32>
      %c0_7 = arith.constant 0 : index
      %c0_8 = arith.constant 0 : index
      %10 = vector.load %arg3[%c0_7, %c0_8] : memref<1x8xf32, #tpu.memory_space<vmem>>, vector<1x8xf32>
      tpu.vector_store %arg3[%c0_7, %c0_8], %9 {strides = array<i32>} : memref<1x8xf32, #tpu.memory_space<vmem>>, vector<1x8xf32>,
    } else {
    }
    %c0 = arith.constant 0 : index
    %c0_1 = arith.constant 0 : index
    %3 = vector.load %arg2[%c0, %c0_1] : memref<8x256xf32, #tpu.memory_space<vmem>>, vector<8x256xf32>
    %cst = arith.constant dense<0xFF800000> : vector<8xf32>
    %4 = vector.multi_reduction <maximumf>, %3, %cst [1] : vector<8x256xf32> to vector<8xf32>
    %c0_2 = arith.constant 0 : index
    %c0_3 = arith.constant 0 : index
    %5 = vector.load %arg3[%c0_2, %c0_3] : memref<1x8xf32, #tpu.memory_space<vmem>>, vector<1x8xf32>
    %6 = vector.shape_cast %4 : vector<8xf32> to vector<1x8xf32>
    %7 = arith.maximumf %5, %6 : vector<1x8xf32>
    %c0_4 = arith.constant 0 : index
    %c0_5 = arith.constant 0 : index
    %8 = vector.load %arg3[%c0_4, %c0_5] : memref<1x8xf32, #tpu.memory_space<vmem>>, vector<1x8xf32>
    tpu.vector_store %arg3[%c0_4, %c0_5], %7 {strides = array<i32>} : memref<1x8xf32, #tpu.memory_space<vmem>>, vector<1x8xf32>,
    return
  }
  func.func @transform_0(%arg0: i32, %arg1: i32) -> (i32, i32) {
    %c0_i32 = arith.constant 0 : i32
    return %arg0, %arg1 : i32, i32
  }
  func.func @transform_1(%arg0: i32, %arg1: i32) -> (i32, i32) {
    %c0_i32 = arith.constant 0 : i32
    %c0_i32_0 = arith.constant 0 : i32
    return %arg0, %c0_i32 : i32, i32
  }
}

</mosaic_0001>

<bundles_post_ra>
// kernel: tpu_custom_call.1
= control target key start
LH: loop header
LB: loop body
LE: loop exit
PB: predicated region body
PF: predicated region fallthrough
CT: control target
= control target key end

     0   :  { %6 = vsyncpa [#allocation3], 0  ;;  %s252_s0 = inlined_call_operand.hbm [shape: f32[8,256], index: 0, kind: input, shape index: {}]   ;;  %s253_s1 = inlined_call_operand.hbm [shape: f32[1,8], index: 1, kind: output, shape index: {}]  }
   0x1   :  { %7 = vsyncpa [#allocation4], 0  ;;  %s211_s6 = smov [#allocation2]   ;;  %s163_s10 = scalar_lea.hbm %s252_s0, 256 }
   0x2   :  { %s14_s7 = sshll.u32 %s211_s6, 4  ;;  %p164_p0 = scmp.ne.s32.totalorder %s252_s0, %s163_s10  ;;  %s15_s7 = int_to_ptr.vmem [resolvable:$true] %s14_s7 }
   0x3   :  { %p167_p1 = scmp.lt.u32.totalorder %s163_s10, %s252_s0 }
   0x5   :  { %p169_p2 = pnand %p167_p1, %p164_p0 }
   0x7   :  { %172 = shalt.err (!%p169_p2)
}
   0x8   :  { %s173_s15 = scalar_lea.vmem %s15_s7, 256  ;;  %p178_p4 = scmp.lt.s32.totalorder %s15_s7, %s15_s7 }
   0x9   :  { %p174_p3 = scmp.ne.s32.totalorder %s15_s7, %s173_s15  ;;  %p179_p5 = scmp.lt.s32.totalorder %s173_s15, %s173_s15 }
   0xb   :  { %p180_p6 = por %p179_p5, %p178_p4 }
   0xd   :  { %p181_p7 = pnand %p180_p6, %p174_p3 }
   0xf   :  { %184 = shalt.err (!%p181_p7)
}
  0x10   :  { %17 = dma.hbm_to_vmem [thread:$0]  %s252_s0, 256, %s15_s7, [#allocation3]  }
  0x11   :  { %207 = dma.done.wait [#allocation3], 256  }
  0x12   :  { %208 = vsyncadd [#allocation3], 4294967040  ;;  %vm25_vm0 = vcmask 57344   ;;  %v212_v0 = vmov -inf   ;;  %v27_v1 = vld [vmem:[#allocation2] sm:$0xff]  ;;  %v28_v2 = vld [vmem:[#allocation2 + $0x8] sm:$0xff]  ;;  %v34_v5 = vlaneseq }
  0x13   :  { %26 = vst.msk [vmem:[#allocation5] sm:$0x1] %vm25_vm0, %v212_v0  ;;  %v29_v3 = vmax.f32 %v27_v1, %v28_v2  ;;  %v213_v4 = vmov 0   ;;  %v214_v9 = vmov 1966171168   ;;  %s215_s0 = smov [#allocation5]  }
  0x14   :  { %162 = vset.pattern.permute.xlu0 %v213_v4  ;;  %v35_v6 = vshrl.u32 %v34_v5, 7  ;;  %v119_v7 = vand.u32 127, %v34_v5  ;;  %v71_v10 = vunpack.c.l.s4 %v214_v9  ;;  %s148_s18 = sshll.u32 %s215_s0, 4  ;;  %s149_s18 = int_to_ptr.vmem [resolvable:$true] %s148_s18 }
  0x15   :  { %30 = vmax.xlane.f32.xlu0 %v29_v3  ;;  %s185_s19 = scalar_lea.vmem %s149_s18, 16  ;;  %s189_s20 = scalar_lea.vmem %s149_s18, 32 }
  0x16   :  { %v122_v8 = vsub.s32 %v119_v7, %v35_v6  ;;  %v72_v11 = vunpack.c.0.s8 %v71_v10  ;;  %v36_v12 = vsub.s32 0, %v35_v6  ;;  %v40_v13 = vsub.s32 1, %v35_v6  ;;  %p186_p8 = scmp.ne.s32.totalorder %s149_s18, %s185_s19  ;;  %p190_p9 = scmp.lt.s32.totalorder %s149_s18, %s149_s18 }
  0x17   :  { %v44_v14 = vsub.s32 2, %v35_v6  ;;  %v48_v15 = vsub.s32 3, %v35_v6  ;;  %v52_v16 = vsub.s32 4, %v35_v6  ;;  %v56_v17 = vsub.s32 5, %v35_v6  ;;  %p191_p10 = scmp.lt.s32.totalorder %s189_s20, %s185_s19 }
  0x18   :  { %v60_v18 = vsub.s32 6, %v35_v6  ;;  %v64_v19 = vsub.s32 7, %v35_v6  ;;  %v75_v21 = vsub.s32 %v72_v11, %v35_v6 }
  0x19   :  { %p192_p11 = por %p191_p10, %p190_p9 }
  0x1a   :  { %v32_v46 = vld [vmem:[#allocation5] sm:$0x1] }
  0x1b   :  { %p193_p12 = pnand %p192_p11, %p186_p8 }
  0xa2   :  { %v31_v20 = vpop.xlane.xlu0 %30 }
  0xa3   :  { %v37_v22 = vrot.slane %v31_v20, %v36_v12  ;;  %v41_v23 = vrot.slane %v31_v20, %v40_v13  ;;  %v45_v24 = vrot.slane %v31_v20, %v44_v14  ;;  %v49_v25 = vrot.slane %v31_v20, %v48_v15 }
  0xa4   :  { %v53_v26 = vrot.slane %v31_v20, %v52_v16  ;;  %v57_v27 = vrot.slane %v31_v20, %v56_v17  ;;  %v61_v28 = vrot.slane %v31_v20, %v60_v18  ;;  %v65_v29 = vrot.slane %v31_v20, %v64_v19 }
  0xa5   :  { %v66_v30 = vcombine.low %v37_v22, %v41_v23  ;;  %v67_v31 = vcombine.low %v45_v24, %v49_v25 }
  0xa6   :  { %v68_v32 = vcombine.low %v53_v26, %v57_v27  ;;  %v69_v33 = vcombine.low %v61_v28, %v65_v29 }
  0xa7   :  { %v76_v34 = vrot.slane %v66_v30, %v75_v21  ;;  %v83_v35 = vrot.slane %v67_v31, %v75_v21 }
  0xa8   :  { %v90_v36 = vrot.slane %v68_v32, %v75_v21  ;;  %v97_v37 = vrot.slane %v69_v33, %v75_v21 }
  0xa9   :  { %v98_v38 = vcombine.low %v76_v34, %v83_v35 }
  0xaa   :  { %v99_v39 = vcombine.low %v90_v36, %v97_v37 }
  0xab   :  { %v106_v40 = vrot.slane %v98_v38, %v75_v21 }
  0xac   :  { %v113_v41 = vrot.slane %v99_v39, %v75_v21 }
  0xae   :  { %v114_v42 = vcombine.low %v106_v40, %v113_v41 }
  0xb0   :  { %116 = vperm.xlu0 %162, %v114_v42  }
 0x12f   :  { %v117_v43 = vpop.permute.xlu0 %116 }
 0x130   :  { %v123_v44 = vrot.slane %v117_v43, %v122_v8 }
 0x132   :  { %v130_v45 = vrot.slane %v123_v44, %v75_v21 }
 0x134   :  { %v137_v47 = vrot.slane %v130_v45, %v75_v21 }
 0x136   :  { %v139_v48 = vmax.f32 %v32_v46, %v137_v47 }
 0x138   :  { %141 = vst.msk [vmem:[#allocation5] sm:$0x1] %vm25_vm0, %v139_v48 }
 0x139   :  { %196 = shalt.err (!%p193_p12)
}
 0x13a   :  { %s197_s23 = scalar_lea.hbm %s253_s1, 16 }
 0x13b   :  { %p198_p13 = scmp.ne.s32.totalorder %s253_s1, %s197_s23  ;;  %p201_p0 = scmp.lt.u32.totalorder %s197_s23, %s253_s1 }
 0x13d   :  { %p203_p1 = pnand %p201_p0, %p198_p13 }
 0x13f   :  { %206 = shalt.err (!%p203_p1)
}
 0x140   :  { %151 = dma.vmem_to_hbm [thread:$0]  %s149_s18, 16, %s253_s1, [#allocation4]  }
 0x141   :  { %209 = dma.done.wait [#allocation4], 16  }
 0x142   :  { %210 = vsyncadd [#allocation4], 4294967280 }
 0x143   :  { %155 = vsyncpa [#allocation3], 1 }
 0x144   :  { %156 = vsyncpa [#allocation4], 1 }

</bundles_post_ra>
